<compile_context>
chip_gen: v5e
topology: v5e:2x2
jax: 0.10.0
libtpu: 0.0.40
codegen_flags: <defaults>
</compile_context>

<pallas_src>
import jax
import jax.numpy as jnp
from jax.experimental import pallas as pl
from jax.experimental.pallas import tpu as pltpu


def _round_up(x: int, m: int) -> int:
    return (x + m - 1) // m * m


def _amp_linear_kernel_acc(x_ref, w_ref, b_ref, o_ref, acc_ref):
    """Multi-K-step path: f32 VMEM accumulator, bias/round/store on finalize."""
    k = pl.program_id(2)

    @pl.when(k == 0)
    def _():
        acc_ref[...] = jnp.zeros_like(acc_ref)

    # 16-bit operands straight to the MXU with f32 accumulation.
    acc_ref[...] += jnp.dot(x_ref[...], w_ref[...],
                            preferred_element_type=jnp.float32)

    @pl.when(k == pl.num_programs(2) - 1)
    def _():
        # Bias added once per output tile (not once per K step).
        y = acc_ref[...] + b_ref[...].astype(jnp.float32)
        # 16-bit model output, then the wrapper's fp32 cast (output_to_fp32).
        o_ref[...] = y.astype(x_ref.dtype).astype(o_ref.dtype)


def _amp_linear_kernel_single_k(x_ref, w_ref, b_ref, o_ref):
    """Kp == tk fast path: no accumulator scratch, no pl.when branches."""
    y = jnp.dot(x_ref[...], w_ref[...], preferred_element_type=jnp.float32)
    y = y + b_ref[...].astype(jnp.float32)
    o_ref[...] = y.astype(x_ref.dtype).astype(o_ref.dtype)


def prepare_amp_linear_params(weight_nk, bias_n, *, amp_dtype=jnp.bfloat16,
                               tn=512, tk=1024):
    """One-time parameter prep (the analogue of `model.to(dtype)` plus layout
    work): cast to the AMP dtype, pre-transpose the torch [N, K] weight to
    [K, N], and pre-pad weight/bias to tile-aligned (Kp, Np) so the hot path
    never copies the weight."""
    N, K = weight_nk.shape
    tn = min(tn, _round_up(N, 128))
    tk = min(tk, _round_up(K, 128))
    Kp, Np = _round_up(K, tk), _round_up(N, tn)
    w_kn = jnp.asarray(weight_nk.astype(amp_dtype).T)            # [K, N]
    if (Kp, Np) != (K, N):
        w_kn = jnp.pad(w_kn, ((0, Kp - K), (0, Np - N)))
    b_1n = bias_n.astype(amp_dtype).reshape(1, N)
    if Np != N:
        b_1n = jnp.pad(b_1n, ((0, 0), (0, Np - N)))
    return dict(w_kn=w_kn, b_1n=b_1n, N=N, K=K, tn=tn, tk=tk,
                amp_dtype=amp_dtype)


def naive_amp_forward(x_f32, params, *, tm=512):
    """x_f32: [B, S, H] fp32 activations -> [B, S, N] fp32 (output_to_fp32)."""
    B, S, H = x_f32.shape
    K, N = params["K"], params["N"]
    assert H == K
    tn, tk = params["tn"], params["tk"]
    amp_dtype = params["amp_dtype"]
    w_kn, b_1n = params["w_kn"], params["b_1n"]
    Kp, Np = w_kn.shape

    M = B * S
    # NOTE(v7x megacore): for large shapes keep at least 2 blocks along one of
    # the "parallel" axes (don't pick tm >= M and tn >= N simultaneously) so
    # both TensorCores get work; a 1x1xK grid serializes onto one TC.
    tm = min(tm, _round_up(M, 8))
    Mp = _round_up(M, tm)

    # AMP input cast (NaiveAMPModel._convert_to_fp16), fused with the
    # reshape/pad so any padded copy of x is 16-bit (half the HBM round trip).
    x16 = x_f32.astype(amp_dtype).reshape(M, K)
    if (Mp, Kp) != (M, K):
        # K zero-padding is required for correct accumulation; do NOT remove it
        # (or the M/N pads) in favor of cdiv grids without adding masking.
        x16 = jnp.pad(x16, ((0, Mp - M), (0, Kp - K)))

    grid_m, grid_n, grid_k = Mp // tm, Np // tn, Kp // tk
    elt = jnp.dtype(amp_dtype).itemsize

    # Realistic HBM traffic for the chosen tiles (x re-read once per N tile,
    # weight re-read once per M tile); advisory for XLA scheduling only.
    cost = pl.CostEstimate(
        flops=2 * Mp * Np * Kp,
        transcendentals=0,
        bytes_accessed=(Mp * Kp * elt) * grid_n
        + (Kp * Np * elt) * grid_m
        + (Np * elt) * grid_m
        + Mp * Np * 4,
    )

    # VMEM budget: double-buffered x/w/bias/out tiles plus the f32 accumulator.
    vmem_bytes = (
        2 * tm * tk * elt + 2 * tk * tn * elt + 2 * tn * elt
        + 2 * tm * tn * 4 + (tm * tn * 4 if grid_k > 1 else 0)
    )
    compiler_kwargs = {}
    if vmem_bytes > (14 << 20):
        # Past v5e's 16 MiB scoped-VMEM default: raise the limit explicitly
        # (v6e/v7x default to 32 MiB; v7x physical is 64 MiB -> keep headroom).
        compiler_kwargs["vmem_limit_bytes"] = min(vmem_bytes + (4 << 20), 60 << 20)

    if grid_k == 1:
        kernel = _amp_linear_kernel_single_k
        dims = ("parallel", "parallel")
        grid_spec = pltpu.PrefetchScalarGridSpec(
            num_scalar_prefetch=0,
            grid=(grid_m, grid_n),
            in_specs=[
                pl.BlockSpec((tm, tk), lambda i, j: (i, 0)),
                pl.BlockSpec((tk, tn), lambda i, j: (0, j)),
                pl.BlockSpec((1, tn), lambda i, j: (0, j)),
            ],
            out_specs=pl.BlockSpec((tm, tn), lambda i, j: (i, j)),
        )
    else:
        kernel = _amp_linear_kernel_acc
        dims = ("parallel", "parallel", "arbitrary")
        grid_spec = pltpu.PrefetchScalarGridSpec(
            num_scalar_prefetch=0,
            grid=(grid_m, grid_n, grid_k),
            in_specs=[
                pl.BlockSpec((tm, tk), lambda i, j, k: (i, k)),
                # TODO(synk): on v5e, pipeline_mode=pl.Buffered(3) on this spec
                # can hide the weight stream if profiling shows exposed DMA.
                pl.BlockSpec((tk, tn), lambda i, j, k: (k, j)),
                pl.BlockSpec((1, tn), lambda i, j, k: (0, j)),
            ],
            out_specs=pl.BlockSpec((tm, tn), lambda i, j, k: (i, j)),
            scratch_shapes=[pltpu.VMEM((tm, tn), jnp.float32)],
        )

    out2d = pl.pallas_call(
        kernel,
        out_shape=jax.ShapeDtypeStruct((Mp, Np), jnp.float32),
        grid_spec=grid_spec,
        compiler_params=pltpu.CompilerParams(dimension_semantics=dims,
                                             **compiler_kwargs),
        cost_estimate=cost,
    )(x16, w_kn, b_1n)

    if (Mp, Np) != (M, N):
        out2d = out2d[:M, :N]
    return out2d.reshape(B, S, N)


if __name__ == "__main__":
    def run_check(B, S, H, N, amp_dtype, tm, tn, tk, tol):
        key = jax.random.PRNGKey(0)
        kx, kw, kb = jax.random.split(key, 3)

        # Deterministic "checkpoint": fp32 params, then model.to(amp_dtype).
        weight_f32 = jax.random.normal(kw, (N, H), dtype=jnp.float32) * 0.05
        bias_f32 = jax.random.normal(kb, (N,), dtype=jnp.float32) * 0.05
        x = jax.random.normal(kx, (B, S, H), dtype=jnp.float32)

        params = prepare_amp_linear_params(weight_f32, bias_f32,
                                           amp_dtype=amp_dtype, tn=tn, tk=tk)
        out = naive_amp_forward(x, params, tm=tm)
        out = jax.block_until_ready(out)
        assert out.shape == (B, S, N)
        assert out.dtype == jnp.float32

        # Pure-JAX reference with the same AMP semantics (16-bit in, f32
        # accumulate, bias, 16-bit model output, fp32 wrapper output).
        w16 = weight_f32.astype(amp_dtype)
        b16 = bias_f32.astype(amp_dtype)
        ref = (
            (x.astype(amp_dtype).reshape(B * S, H).astype(jnp.float32)
             @ w16.T.astype(jnp.float32)
             + b16.astype(jnp.float32))
            .astype(amp_dtype)
            .astype(jnp.float32)
            .reshape(B, S, N)
        )
        err = float(jnp.max(jnp.abs(out - ref)))
        assert jnp.allclose(out, ref, atol=tol, rtol=tol), err

    # Small shapes (batch=2, seq=8, hidden=32): single-K fast path with the
    # bf16 AMP dtype (documented perf choice -- native MXU path on all chips).
    run_check(B=2, S=8, H=32, N=32, amp_dtype=jnp.bfloat16,
              tm=512, tn=512, tk=1024, tol=2e-2)

    # Multi-K accumulator path (K padded 200->256, two K steps) with the
    # torch-fp16-faithful AMP dtype (slower MXU path, same kernel).
    run_check(B=2, S=8, H=200, N=96, amp_dtype=jnp.float16,
              tm=128, tn=128, tk=128, tol=1e-2)

    # TODO(synk): dist.all_reduce buffer sync and fp32 forward hooks are no-ops
    # here (world_size=1, no fp32-marked submodules) and are not lowered.
    print("KERNEL_OK")
</pallas_src>

<mosaic_0001>
module attributes {stable_mosaic.version = 11 : i64} {
  func.func @_amp_linear_kernel_single_k(%arg0: i32, %arg1: i32, %arg2: memref<16x128xbf16, #tpu.memory_space<vmem>>, %arg3: memref<128x128xbf16, #tpu.memory_space<vmem>>, %arg4: memref<1x128xbf16, #tpu.memory_space<vmem>>, %arg5: memref<16x128xf32, #tpu.memory_space<vmem>>) attributes {dimension_semantics = [#tpu.dimension_semantics<parallel>, #tpu.dimension_semantics<parallel>], iteration_bounds = array<i64: 1, 1>, scalar_prefetch = 0 : i64, scratch_operands = 0 : i64, tpu.core_type = #tpu.core_type<tc>, window_params = [{transform_indices = @transform_0, window_bounds = array<i64: 16, 128>}, {transform_indices = @transform_1, window_bounds = array<i64: 128, 128>}, {transform_indices = @transform_2, window_bounds = array<i64: 1, 128>}, {transform_indices = @transform_3, window_bounds = array<i64: 16, 128>}]} {
    %c0 = arith.constant 0 : index
    %c0_0 = arith.constant 0 : index
    %0 = vector.load %arg2[%c0, %c0_0] : memref<16x128xbf16, #tpu.memory_space<vmem>>, vector<16x128xbf16>
    %c0_1 = arith.constant 0 : index
    %c0_2 = arith.constant 0 : index
    %1 = vector.load %arg3[%c0_1, %c0_2] : memref<128x128xbf16, #tpu.memory_space<vmem>>, vector<128x128xbf16>
    %cst = arith.constant dense<0.000000e+00> : vector<16x128xf32>
    %2 = tpu.matmul %0, %1, %cst {dimension_numbers = #tpu.dot_dimension_numbers<[1], [0], [0], [1], [0, 0, 1, 1], [], []>} : vector<16x128xbf16>, vector<128x128xbf16>, vector<16x128xf32> -> vector<16x128xf32>
    %c0_3 = arith.constant 0 : index
    %c0_4 = arith.constant 0 : index
    %3 = vector.load %arg4[%c0_3, %c0_4] : memref<1x128xbf16, #tpu.memory_space<vmem>>, vector<1x128xbf16>
    %4 = arith.extf %3 : vector<1x128xbf16> to vector<1x128xf32>
    %5 = vector.broadcast %4 : vector<1x128xf32> to vector<16x128xf32>
    %6 = arith.addf %2, %5 : vector<16x128xf32>
    %7 = arith.truncf %6 : vector<16x128xf32> to vector<16x128xbf16>
    %8 = arith.extf %7 : vector<16x128xbf16> to vector<16x128xf32>
    %c0_5 = arith.constant 0 : index
    %c0_6 = arith.constant 0 : index
    %9 = vector.load %arg5[%c0_5, %c0_6] : memref<16x128xf32, #tpu.memory_space<vmem>>, vector<16x128xf32>
    tpu.vector_store %arg5[%c0_5, %c0_6], %8 {strides = array<i32>} : memref<16x128xf32, #tpu.memory_space<vmem>>, vector<16x128xf32>,
    return
  }
  func.func @transform_0(%arg0: i32, %arg1: i32) -> (i32, i32) {
    %c0_i32 = arith.constant 0 : i32
    %c0_i32_0 = arith.constant 0 : i32
    return %arg0, %c0_i32 : i32, i32
  }
  func.func @transform_1(%arg0: i32, %arg1: i32) -> (i32, i32) {
    %c0_i32 = arith.constant 0 : i32
    %c0_i32_0 = arith.constant 0 : i32
    return %c0_i32, %arg1 : i32, i32
  }
  func.func @transform_2(%arg0: i32, %arg1: i32) -> (i32, i32) {
    %c0_i32 = arith.constant 0 : i32
    %c0_i32_0 = arith.constant 0 : i32
    return %c0_i32, %arg1 : i32, i32
  }
  func.func @transform_3(%arg0: i32, %arg1: i32) -> (i32, i32) {
    %c0_i32 = arith.constant 0 : i32
    return %arg0, %arg1 : i32, i32
  }
}

</mosaic_0001>

<bundles_post_ra>
// kernel: tpu_custom_call.1
= control target key start
LH: loop header
LB: loop body
LE: loop exit
PB: predicated region body
PF: predicated region fallthrough
CT: control target
= control target key end

     0   :  { %8 = vsyncpa [#allocation3], 0  ;;  %s331_s0 = inlined_call_operand.hbm [shape: bf16[16,128], index: 0, kind: input, shape index: {}]   ;;  %s332_s1 = inlined_call_operand.hbm [shape: bf16[128,128], index: 1, kind: input, shape index: {}]   ;;  %s333_s2 = inlined_call_operand.vmem [shape: bf16[1,128], index: 2, kind: input, shape index: {}]   ;;  %s334_s3 = inlined_call_operand.hbm [shape: f32[16,128], index: 3, kind: output, shape index: {}]  }
   0x1   :  { %9 = vsyncpa [#allocation6], 0 }
   0x2   :  { %10 = vsyncpa [#allocation4], 0  ;;  %s15_s14 = sshll.u32 %s331_s0, 4  ;;  %s292_s15 = smov [#allocation2]   ;;  %s16_s14 = int_to_ptr.hbm [resolvable:$true] %s15_s14 }
   0x3   :  { %s17_s16 = sshll.u32 %s292_s15, 4  ;;  %s28_s19 = sshll.u32 %s332_s1, 4  ;;  %s18_s16 = int_to_ptr.vmem [resolvable:$true] %s17_s16  ;;  %s29_s19 = int_to_ptr.hbm [resolvable:$true] %s28_s19 }
   0x4   :  { %s293_s20 = smov 64   ;;  %s294_s21 = smov 4  }
   0x5   :  { %23 = dma.hbm_to_vmem [thread:$0]  %s16_s14, 128, %s18_s16, [#allocation3], %s293_s20, %s293_s20, %s294_s21  }
   0x6   :  { %s295_s22 = smov [#allocation5]  }
   0x7   :  { %s30_s23 = sshll.u32 %s295_s22, 4  ;;  %s31_s23 = int_to_ptr.vmem [resolvable:$true] %s30_s23 }
   0x8   :  { %36 = dma.hbm_to_vmem [thread:$0]  %s29_s19, 1024, %s31_s23, [#allocation6], %s293_s20, %s293_s20, %s294_s21  }
   0x9   :  { %286 = dma.done.wait [#allocation3], 128  }
   0xa   :  { %287 = vsyncadd [#allocation3], 4294967168 }
   0xb   :  { %288 = dma.done.wait [#allocation6], 1024  }
   0xc   :  { %289 = vsyncadd [#allocation6], 4294966272  ;;  %v206_v0 = vld [vmem:[#allocation5 + $0x38] sm:$0xff]  ;;  %v205_v1 = vld [vmem:[#allocation5 + $0x30] sm:$0xff]  ;;  %s296_s24 = smov [#allocation7]   ;;  %s148_s28 = sshll.u32 %s334_s3, 4  ;;  %s149_s28 = int_to_ptr.hbm [resolvable:$true] %s148_s28 }
   0xd   :  { %122 = vmatpush.bf16.msra.mxu0 %v206_v0  ;;  %v204_v2 = vld [vmem:[#allocation5 + $0x28] sm:$0xff]  ;;  %v203_v3 = vld [vmem:[#allocation5 + $0x20] sm:$0xff]  ;;  %v202_v4 = vld [vmem:[#allocation5 + $0x18] sm:$0xff]  ;;  %s146_s25 = sshll.u32 %s296_s24, 4  ;;  %s298_s29 = smov 8   ;;  %s147_s25 = int_to_ptr.vmem [resolvable:$true] %s146_s25 }
   0xe   :  { %v201_v5 = vld [vmem:[#allocation5 + $0x10] sm:$0xff]  ;;  %v200_v6 = vld [vmem:[#allocation5 + $0x8] sm:$0xff]  ;;  %v199_v7 = vld [vmem:[#allocation5] sm:$0xff] }
   0xf   :  { %v198_v8 = vld [vmem:[#allocation2] sm:$0xff] }
  0x10   :  { %v65_v9 = vld [vmem:[%s333_s2] sm:$0x1]  ;;  %s297_s2 = smov 128  }
  0x11   :  { %123 = vmatpush.bf16.msra.mxu0 %v205_v1  ;;  %v66_v10 = vunpack.c.l.bf16 %v65_v9 }
  0x13   :  { %v67_v11 = vperm.slane %v66_v10, 0 }
  0x15   :  { %124 = vmatpush.bf16.msra.mxu0 %v204_v2 }
  0x19   :  { %125 = vmatpush.bf16.msra.mxu0 %v203_v3 }
  0x1d   :  { %126 = vmatpush.bf16.msra.mxu0 %v202_v4 }
  0x21   :  { %127 = vmatpush.bf16.msra.mxu0 %v201_v5 }
  0x25   :  { %128 = vmatpush.bf16.msra.mxu0 %v200_v6 }
  0x29   :  { %129 = vmatpush.bf16.msra.mxu0 %v199_v7 }
  0x2c   :  { %130 = vmatmul.bf16.vlgmr.msra.gmra.mxu0 %v198_v8 }
  0xa9   :  { %v131_v12 = vpop.f32.mrf.mxu0 }
  0xaa   :  { %v132_v13 = vadd.f32 %v131_v12, %v67_v11 }
  0xac   :  { %v136_v14 = vpack.c.bf16 %v132_v13, %v132_v13 }
  0xae   :  { %v138_v15 = vunpack.c.l.bf16 %v136_v14 }
  0xb0   :  { %140 = vst [vmem:[#allocation7] sm:$0xff] %v138_v15 }
  0xb1   :  { %v133_v16 = vpop.f32.mrf.mxu0 }
  0xb2   :  { %v134_v17 = vadd.f32 %v133_v16, %v67_v11 }
  0xb4   :  { %v137_v18 = vpack.c.bf16 %v134_v17, %v134_v17 }
  0xb6   :  { %v139_v19 = vunpack.c.l.bf16 %v137_v18 }
  0xb8   :  { %141 = vst [vmem:[#allocation7 + $0x8] sm:$0xff] %v139_v19 }
  0xb9   :  { %154 = dma.vmem_to_hbm [thread:$0]  %s147_s25, 256, %s149_s28, [#allocation4], %s297_s2, %s297_s2, %s298_s29  }
  0xba   :  { %290 = dma.done.wait [#allocation4], 256  }
  0xbb   :  { %291 = vsyncadd [#allocation4], 4294967040 }
  0xbc   :  { %159 = vsyncpa [#allocation3], 1 }
  0xbd   :  { %160 = vsyncpa [#allocation6], 1 }
  0xbe   :  { %161 = vsyncpa [#allocation4], 1 }

</bundles_post_ra>
